<compile_context>
chip_gen: v6e
topology: v6e:2x2x1
jax: 0.10.0
libtpu: 0.0.40
codegen_flags: <defaults>
</compile_context>

<pallas_src>
import math
from functools import partial

import jax
import jax.numpy as jnp
from jax import lax
from jax.experimental import pallas as pl
from jax.experimental.pallas import tpu as pltpu

NORM_EPS = 1e-5                      # args.norm_eps


def _vmem_limit_bytes():
    # Generation-aware scoped-VMEM budget: ~3/4 of physical, capped at 96 MiB
    # (-> ~96 MiB on v5e/v6e's 128 MiB physical, ~48 MiB on v7x's 64 MiB).
    cap = 128 * 1024 * 1024
    try:
        cap = int(getattr(pltpu.get_tpu_info(), "vmem_capacity_bytes", cap))
    except Exception:
        pass
    return min(96 * 1024 * 1024, (cap * 3) // 4)


VMEM_LIMIT = _vmem_limit_bytes()


def _rms(x, eps):
    # x: (N, D) float32 -> x * rsqrt(mean(x^2, -1) + eps)
    ms = jnp.mean(x * x, axis=-1, keepdims=True)
    return x * lax.rsqrt(ms + eps)


def _pick_tile(n, candidates):
    for c in candidates:
        if n % c == 0:
            return c
    return n


# ---------------- Kernel 1: RMSNorm + fused QKV projection ----------------
# grid = (row_tiles, qkv_col_tiles); RMSNorm(x) is computed once per row tile
# (at col step 0) into a bf16 scratch, then one MXU matmul per (row, col) tile.
def rmsnorm_qkv_kernel(x_ref, g_ref, wqkv_ref, qkv_ref, xn_s):
    @pl.when(pl.program_id(1) == 0)
    def _():
        x = x_ref[...].astype(jnp.float32)
        xn_s[...] = (_rms(x, NORM_EPS) * g_ref[...]).astype(jnp.bfloat16)

    qkv_ref[...] = jnp.dot(xn_s[...], wqkv_ref[...],
                           preferred_element_type=jnp.float32).astype(qkv_ref.dtype)


# ------------- Kernel 2: RoPE + flash attention (per head / tile) -------------
# wq/wk columns were pre-permuted so each head's hd lanes are [even | odd];
# rotate-half RoPE = x*cos_full + roll(x, hd/2)*sin_signed (lane-dense tables).
# The 1/sqrt(hd) scale is pre-folded into the q tables.
def flash_rope_attn_kernel(cq_ref, sq_ref, ck_ref, sk_ref,
                           q_ref, k_ref, v_ref, o_ref,
                           m_s, l_s, acc_s, *, causal):
    qi = pl.program_id(2)
    ki = pl.program_id(3)
    Sq, hd = q_ref.shape
    Skv = k_ref.shape[0]
    half = hd // 2

    @pl.when(ki == 0)
    def _():
        m_s[...] = jnp.full(m_s.shape, -1e30, jnp.float32)
        l_s[...] = jnp.zeros_like(l_s)
        acc_s[...] = jnp.zeros_like(acc_s)

    q_start = qi * Sq
    kv_start = ki * Skv

    def compute():
        # RoPE in f32 on the VPU; roll goes to the (otherwise idle) XLU slot.
        q = q_ref[...].astype(jnp.float32)
        k = k_ref[...].astype(jnp.float32)
        qr = q * cq_ref[...] + pltpu.roll(q, half, 1) * sq_ref[...]   # scaled
        kr = k * ck_ref[...] + pltpu.roll(k, half, 1) * sk_ref[...]
        s = lax.dot_general(qr.astype(jnp.bfloat16), kr.astype(jnp.bfloat16),
                            (((1,), (1,)), ((), ())),
                            preferred_element_type=jnp.float32)       # (Sq, Skv)
        if causal:
            qpos = q_start + lax.broadcasted_iota(jnp.int32, s.shape, 0)
            kpos = kv_start + lax.broadcasted_iota(jnp.int32, s.shape, 1)
            s = jnp.where(kpos <= qpos, s, -1e30)
        m_new = jnp.maximum(m_s[...], jnp.max(s, axis=-1, keepdims=True))
        alpha = jnp.exp(m_s[...] - m_new)
        p = jnp.exp(s - m_new)
        l_s[...] = alpha * l_s[...] + jnp.sum(p, axis=-1, keepdims=True)
        acc_s[...] = alpha * acc_s[...] + jnp.dot(
            p.astype(jnp.bfloat16), v_ref[...], preferred_element_type=jnp.float32)
        m_s[...] = m_new

    if causal:
        # skip all compute for kv tiles entirely above the causal diagonal
        pl.when(kv_start <= q_start + Sq - 1)(compute)
    else:
        compute()

    @pl.when(ki == pl.num_programs(3) - 1)
    def _():
        o_ref[...] = (acc_s[...] * pl.reciprocal(l_s[...], approx=True)
                      ).astype(o_ref.dtype)


# -- Kernel 3: Wo + residual + RMSNorm + SwiGLU FFN + residual (fused, K-tiled) --
def wo_res_ffn_kernel(x_ref, attn_ref, wo_ref, g_ref, w1_ref, w3_ref, w2_ref,
                      out_ref, h_s, hn_s, acc):
    kstep = pl.program_id(1)

    @pl.when(kstep == 0)
    def _():
        h = x_ref[...].astype(jnp.float32) + jnp.dot(
            attn_ref[...], wo_ref[...], preferred_element_type=jnp.float32)
        h_s[...] = h
        hn_s[...] = (_rms(h, NORM_EPS) * g_ref[...]).astype(jnp.bfloat16)
        acc[...] = jnp.zeros_like(acc)

    hn = hn_s[...]                                                    # bf16
    a = jnp.dot(hn, w1_ref[...], preferred_element_type=jnp.float32)  # (TM, TH)
    b = jnp.dot(hn, w3_ref[...], preferred_element_type=jnp.float32)
    gated = (a * jax.nn.sigmoid(a) * b).astype(jnp.bfloat16)          # SiLU(a)*b
    acc[...] += jnp.dot(gated, w2_ref[...], preferred_element_type=jnp.float32)

    @pl.when(kstep == pl.num_programs(1) - 1)
    def _():
        out_ref[...] = (h_s[...] + acc[...]).astype(out_ref.dtype)


# --------------------------- parameter preparation ---------------------------
def prepare_params(params):
    """One-time prep (load time, outside the hot path): transpose weights to
    (in, out), cast to bf16, permute wq/wk columns so each head's lanes are
    [even indices | odd indices] (rotate-half RoPE), and fuse q/k/v into one
    (D, 3D) weight."""
    H = params["n_heads"]
    D = params["wq"].shape[0]
    hd = D // H
    half = hd // 2
    perm = []
    for h in range(H):
        base = h * hd
        perm += [base + 2 * i for i in range(half)]
        perm += [base + 2 * i + 1 for i in range(half)]
    perm = jnp.array(perm, dtype=jnp.int32)
    wq = params["wq"].T[:, perm]
    wk = params["wk"].T[:, perm]
    wv = params["wv"].T
    wqkv = jnp.concatenate([wq, wk, wv], axis=1).astype(jnp.bfloat16)   # (D, 3D)
    return {
        "n_heads": H,
        "head_dim": hd,
        "wqkv": wqkv,
        "wo": params["wo"].T.astype(jnp.bfloat16),
        "w1": params["w1"].T.astype(jnp.bfloat16),
        "w3": params["w3"].T.astype(jnp.bfloat16),
        "w2": params["w2"].T.astype(jnp.bfloat16),
        "attn_norm_w": params["attn_norm_w"].reshape(1, -1).astype(jnp.float32),
        "ffn_norm_w": params["ffn_norm_w"].reshape(1, -1).astype(jnp.float32),
    }


def prepare_rope(cos, sin, head_dim):
    """Lane-dense (S, head_dim) RoPE tables for the permuted [even|odd] head
    layout.  The 1/sqrt(head_dim) attention scale is folded into the q tables
    (zero extra VPU work in the kernel)."""
    scale = 1.0 / math.sqrt(head_dim)
    cos_f = jnp.concatenate([cos, cos], axis=-1).astype(jnp.float32)
    sin_f = jnp.concatenate([-sin, sin], axis=-1).astype(jnp.float32)
    return {"cos_q": cos_f * scale, "sin_q": sin_f * scale,
            "cos_k": cos_f, "sin_k": sin_f}


# ------------------------------ forward wrapper ------------------------------
def encoder_block(x, pp, rope, *, row_tile=None, ffn_tile=None, qkv_col_tile=None,
                  q_tile=None, kv_tile=None, causal=True):
    B, S, D = x.shape
    H = pp["n_heads"]
    hd = pp["head_dim"]
    assert hd % 128 == 0, "head_dim must be a multiple of 128 (lane-dense heads)"
    N = B * S
    hidden = pp["w1"].shape[1]

    TM = row_tile or _pick_tile(N, (512, 256, 128, 64, 32, 16, 8))
    TH = ffn_tile or _pick_tile(hidden, (1024, 512, 256, 128))
    TN = qkv_col_tile or _pick_tile(3 * D, (1024, 512, 256, 128))
    SQ = q_tile or _pick_tile(S, (256, 128, 64, 32, 16, 8))
    SK = kv_tile or _pick_tile(S, (512, 256, 128, 64, 32, 16, 8))
    assert N % TM == 0 and hidden % TH == 0 and (3 * D) % TN == 0
    assert S % SQ == 0 and S % SK == 0
    nQ, nKV = S // SQ, S // SK

    # Residual path keeps the caller's dtype (pass bf16 x at production sizes
    # to halve K1/K3 HBM traffic; f32 accumulation happens inside the kernels).
    xf = x.reshape(N, D)

    # --- Kernel 1: RMSNorm + fused QKV (row tiles parallel, weight cols stream) ---
    qkv = pl.pallas_call(
        rmsnorm_qkv_kernel,
        grid=(N // TM, (3 * D) // TN),
        in_specs=[pl.BlockSpec((TM, D), lambda i, j: (i, 0)),
                  pl.BlockSpec((1, D), lambda i, j: (0, 0)),
                  pl.BlockSpec((D, TN), lambda i, j: (0, j))],
        out_specs=pl.BlockSpec((TM, TN), lambda i, j: (i, j)),
        out_shape=jax.ShapeDtypeStruct((N, 3 * D), jnp.bfloat16),
        scratch_shapes=[pltpu.VMEM((TM, D), jnp.bfloat16)],      # RMSNorm(x)*g
        compiler_params=pltpu.CompilerParams(
            dimension_semantics=("parallel", "arbitrary"),
            vmem_limit_bytes=VMEM_LIMIT),
        cost_estimate=pl.CostEstimate(
            flops=6 * N * D * D, transcendentals=0,
            bytes_accessed=N * D * x.dtype.itemsize + 3 * D * D * 2 + 3 * N * D * 2),
    )(xf, pp["attn_norm_w"], pp["wqkv"])

    # --- Kernel 2: RoPE + flash attention (grid over B, H, q tiles, kv tiles) ---
    attn = pl.pallas_call(
        partial(flash_rope_attn_kernel, causal=causal),
        grid=(B, H, nQ, nKV),
        in_specs=[pl.BlockSpec((SQ, hd), lambda b, h, qi, ki: (qi, 0)),   # cos_q
                  pl.BlockSpec((SQ, hd), lambda b, h, qi, ki: (qi, 0)),   # sin_q
                  pl.BlockSpec((SK, hd), lambda b, h, qi, ki: (ki, 0)),   # cos_k
                  pl.BlockSpec((SK, hd), lambda b, h, qi, ki: (ki, 0)),   # sin_k
                  pl.BlockSpec((SQ, hd), lambda b, h, qi, ki: (b * nQ + qi, h)),
                  pl.BlockSpec((SK, hd), lambda b, h, qi, ki: (b * nKV + ki, H + h)),
                  pl.BlockSpec((SK, hd), lambda b, h, qi, ki: (b * nKV + ki, 2 * H + h))],
        out_specs=pl.BlockSpec((SQ, hd), lambda b, h, qi, ki: (b * nQ + qi, h)),
        out_shape=jax.ShapeDtypeStruct((N, D), jnp.bfloat16),
        scratch_shapes=[pltpu.VMEM((SQ, 1), jnp.float32),     # m (running max)
                        pltpu.VMEM((SQ, 1), jnp.float32),     # l (running denom)
                        pltpu.VMEM((SQ, hd), jnp.float32)],   # acc
        compiler_params=pltpu.CompilerParams(
            dimension_semantics=("parallel", "parallel", "parallel", "arbitrary"),
            vmem_limit_bytes=VMEM_LIMIT),
        cost_estimate=pl.CostEstimate(
            flops=4 * B * H * S * S * hd, transcendentals=B * H * S * S,
            bytes_accessed=4 * N * D * 2 + 4 * S * hd * 4),
    )(rope["cos_q"], rope["sin_q"], rope["cos_k"], rope["sin_k"], qkv, qkv, qkv)

    # --- Kernel 3: Wo + residual + RMSNorm + SwiGLU FFN + residual (fused) ---
    out = pl.pallas_call(
        wo_res_ffn_kernel,
        grid=(N // TM, hidden // TH),     # rows parallel, hidden = reduction
        in_specs=[pl.BlockSpec((TM, D), lambda i, j: (i, 0)),
                  pl.BlockSpec((TM, D), lambda i, j: (i, 0)),
                  pl.BlockSpec((D, D), lambda i, j: (0, 0)),
                  pl.BlockSpec((1, D), lambda i, j: (0, 0)),
                  # optionally: pipeline_mode=pl.Buffered(3) on w1/w3/w2 if the
                  # hidden reduction has few, DMA-exposed steps at production TH
                  pl.BlockSpec((D, TH), lambda i, j: (0, j)),
                  pl.BlockSpec((D, TH), lambda i, j: (0, j)),
                  pl.BlockSpec((TH, D), lambda i, j: (j, 0))],
        out_specs=pl.BlockSpec((TM, D), lambda i, j: (i, 0)),
        out_shape=jax.ShapeDtypeStruct((N, D), x.dtype),
        scratch_shapes=[pltpu.VMEM((TM, D), jnp.float32),    # h (post-attn residual)
                        pltpu.VMEM((TM, D), jnp.bfloat16),   # RMSNorm(h)*g, bf16
                        pltpu.VMEM((TM, D), jnp.float32)],   # FFN accumulator
        compiler_params=pltpu.CompilerParams(
            dimension_semantics=("parallel", "arbitrary"),
            vmem_limit_bytes=VMEM_LIMIT),
        cost_estimate=pl.CostEstimate(
            flops=2 * N * D * D + 6 * N * D * hidden,
            transcendentals=N * hidden,
            bytes_accessed=N * D * x.dtype.itemsize + N * D * 2 + D * D * 2
                           + 3 * D * hidden * 2 + N * D * x.dtype.itemsize),
    )(xf, attn, pp["wo"], pp["ffn_norm_w"], pp["w1"], pp["w3"], pp["w2"])

    return out.reshape(B, S, D)


# --------------------------- pure-JAX f32 reference ---------------------------
def ref_forward(x, params, cos, sin, causal=True):
    B, S, D = x.shape
    H = params["n_heads"]
    hd = D // H

    def rms(t, w):
        tf = t.astype(jnp.float32)
        return w * (tf * lax.rsqrt(jnp.mean(tf * tf, -1, keepdims=True) + NORM_EPS))

    xn = rms(x, params["attn_norm_w"])
    q = (xn @ params["wq"].T).reshape(B, S, H, hd)
    k = (xn @ params["wk"].T).reshape(B, S, H, hd)
    v = (xn @ params["wv"].T).reshape(B, S, H, hd)

    def rope(t):
        tr = t.reshape(B, S, H, hd // 2, 2)
        te, to = tr[..., 0], tr[..., 1]
        c = cos[None, :, None, :]
        s = sin[None, :, None, :]
        return jnp.stack([te * c - to * s, te * s + to * c], -1).reshape(B, S, H, hd)

    q, k = rope(q), rope(k)
    q = q.transpose(0, 2, 1, 3)
    k = k.transpose(0, 2, 1, 3)
    v = v.transpose(0, 2, 1, 3)
    scores = jnp.einsum("bhqd,bhkd->bhqk", q, k) / math.sqrt(hd)
    if causal:
        keep = jnp.tril(jnp.ones((S, S), dtype=bool))
        scores = jnp.where(keep[None, None], scores, -jnp.inf)
    p = jax.nn.softmax(scores, axis=-1)
    o = jnp.einsum("bhqk,bhkd->bhqd", p, v).transpose(0, 2, 1, 3).reshape(B, S, D)
    h = x + o @ params["wo"].T
    hn = rms(h, params["ffn_norm_w"])
    ff = (jax.nn.silu(hn @ params["w1"].T) * (hn @ params["w3"].T)) @ params["w2"].T
    return h + ff


def precompute_freqs(head_dim, seq_len, theta=10000.0):
    inv = 1.0 / (theta ** (jnp.arange(0, head_dim, 2, dtype=jnp.float32) / head_dim))
    t = jnp.arange(seq_len, dtype=jnp.float32)
    ang = jnp.outer(t, inv)                       # (S, head_dim/2)
    return jnp.cos(ang), jnp.sin(ang)


if __name__ == "__main__":
    # small config consistent with ModelArgs semantics (multiple_of=256 default);
    # head_dim = 128 so per-head blocks are exactly lane-dense (as in LLaMA).
    B, S, dim, n_heads = 2, 64, 256, 2
    head_dim = dim // n_heads                     # 128
    multiple_of = 256
    hidden_dim = int(2 * (4 * dim) / 3)
    hidden_dim = multiple_of * ((hidden_dim + multiple_of - 1) // multiple_of)  # 768

    key = jax.random.PRNGKey(0)
    ks = jax.random.split(key, 8)
    sc = 0.05
    params = {
        "n_heads": n_heads,
        "wq": sc * jax.random.normal(ks[0], (dim, dim), jnp.float32),
        "wk": sc * jax.random.normal(ks[1], (dim, dim), jnp.float32),
        "wv": sc * jax.random.normal(ks[2], (dim, dim), jnp.float32),
        "wo": sc * jax.random.normal(ks[3], (dim, dim), jnp.float32),
        "w1": sc * jax.random.normal(ks[4], (hidden_dim, dim), jnp.float32),
        "w2": sc * jax.random.normal(ks[5], (dim, hidden_dim), jnp.float32),
        "w3": sc * jax.random.normal(ks[6], (hidden_dim, dim), jnp.float32),
        "attn_norm_w": jnp.ones((dim,), jnp.float32),
        "ffn_norm_w": jnp.ones((dim,), jnp.float32),
    }

    x = jax.random.normal(ks[7], (B, S, dim), jnp.float32)
    cos, sin = precompute_freqs(head_dim, S)

    pp = prepare_params(params)                   # one-time, load-time prep
    rope = prepare_rope(cos, sin, head_dim)
    # q_tile/kv_tile=32 -> 2 q blocks x 2 kv blocks: exercises the online
    # softmax reduction and the causal kv-tile skip at this small test shape.
    out = encoder_block(x, pp, rope, q_tile=32, kv_tile=32)
    out = jax.block_until_ready(out)

    ref = ref_forward(x, params, cos, sin)
    assert out.shape == (B, S, dim)
    outf = out.astype(jnp.float32)
    err = float(jnp.max(jnp.abs(outf - ref)))
    # bf16 MXU operands + approx reciprocal vs f32 reference -> widened tolerance
    assert jnp.allclose(outf, ref, atol=3e-2, rtol=3e-2), err
    print("KERNEL_OK")
</pallas_src>

<mosaic_0001>
module attributes {stable_mosaic.version = 11 : i64} {
  func.func @rmsnorm_qkv_kernel(%arg0: i32, %arg1: i32, %arg2: memref<128x256xf32, #tpu.memory_space<vmem>>, %arg3: memref<1x256xf32, #tpu.memory_space<vmem>>, %arg4: memref<256x256xbf16, #tpu.memory_space<vmem>>, %arg5: memref<128x256xbf16, #tpu.memory_space<vmem>>, %arg6: memref<128x256xbf16, #tpu.memory_space<vmem>>) attributes {dimension_semantics = [#tpu.dimension_semantics<parallel>, #tpu.dimension_semantics<arbitrary>], iteration_bounds = array<i64: 1, 3>, scalar_prefetch = 0 : i64, scratch_operands = 1 : i64, tpu.core_type = #tpu.core_type<tc>, window_params = [{transform_indices = @transform_0, window_bounds = array<i64: 128, 256>}, {pipeline_mode = #tpu.pipeline_mode<synchronous>, transform_indices = @transform_1, window_bounds = array<i64: 1, 256>}, {transform_indices = @transform_2, window_bounds = array<i64: 256, 256>}, {transform_indices = @transform_3, window_bounds = array<i64: 128, 256>}]} {
    %c0_i32 = arith.constant 0 : i32
    %0 = arith.cmpi eq, %arg1, %c0_i32 : i32
    %1 = arith.extui %0 : i1 to i32
    %c0_i32_0 = arith.constant 0 : i32
    %2 = arith.cmpi ne, %1, %c0_i32_0 : i32
    scf.if %2 {
      %c0_6 = arith.constant 0 : index
      %c0_7 = arith.constant 0 : index
      %8 = vector.load %arg2[%c0_6, %c0_7] : memref<128x256xf32, #tpu.memory_space<vmem>>, vector<128x256xf32>
      %9 = arith.mulf %8, %8 : vector<128x256xf32>
      %cst_8 = arith.constant dense<0.000000e+00> : vector<128xf32>
      %10 = vector.multi_reduction <add>, %9, %cst_8 [1] : vector<128x256xf32> to vector<128xf32>
      %11 = vector.shape_cast %10 : vector<128xf32> to vector<128x1xf32>
      %cst_9 = arith.constant 2.560000e+02 : f32
      %12 = vector.broadcast %cst_9 : f32 to vector<128x1xf32>
      %13 = arith.divf %11, %12 : vector<128x1xf32>
      %cst_10 = arith.constant 9.99999974E-6 : f32
      %14 = vector.broadcast %cst_10 : f32 to vector<128x1xf32>
      %15 = arith.addf %13, %14 : vector<128x1xf32>
      %16 = math.rsqrt %15 : vector<128x1xf32>
      %17 = vector.broadcast %16 : vector<128x1xf32> to vector<128x256xf32>
      %18 = arith.mulf %8, %17 : vector<128x256xf32>
      %c0_11 = arith.constant 0 : index
      %c0_12 = arith.constant 0 : index
      %19 = vector.load %arg3[%c0_11, %c0_12] : memref<1x256xf32, #tpu.memory_space<vmem>>, vector<1x256xf32>
      %20 = vector.broadcast %19 : vector<1x256xf32> to vector<128x256xf32>
      %21 = arith.mulf %18, %20 : vector<128x256xf32>
      %22 = arith.truncf %21 : vector<128x256xf32> to vector<128x256xbf16>
      %c0_13 = arith.constant 0 : index
      %c0_14 = arith.constant 0 : index
      %23 = vector.load %arg6[%c0_13, %c0_14] : memref<128x256xbf16, #tpu.memory_space<vmem>>, vector<128x256xbf16>
      tpu.vector_store %arg6[%c0_13, %c0_14], %22 {strides = array<i32>} : memref<128x256xbf16, #tpu.memory_space<vmem>>, vector<128x256xbf16>,
    } else {
    }
    %c0 = arith.constant 0 : index
    %c0_1 = arith.constant 0 : index
    %3 = vector.load %arg6[%c0, %c0_1] : memref<128x256xbf16, #tpu.memory_space<vmem>>, vector<128x256xbf16>
    %c0_2 = arith.constant 0 : index
    %c0_3 = arith.constant 0 : index
    %4 = vector.load %arg4[%c0_2, %c0_3] : memref<256x256xbf16, #tpu.memory_space<vmem>>, vector<256x256xbf16>
    %cst = arith.constant dense<0.000000e+00> : vector<128x256xf32>
    %5 = tpu.matmul %3, %4, %cst {dimension_numbers = #tpu.dot_dimension_numbers<[1], [0], [0], [1], [0, 0, 1, 1], [], []>} : vector<128x256xbf16>, vector<256x256xbf16>, vector<128x256xf32> -> vector<128x256xf32>
    %6 = arith.truncf %5 : vector<128x256xf32> to vector<128x256xbf16>
    %c0_4 = arith.constant 0 : index
    %c0_5 = arith.constant 0 : index
    %7 = vector.load %arg5[%c0_4, %c0_5] : memref<128x256xbf16, #tpu.memory_space<vmem>>, vector<128x256xbf16>
    tpu.vector_store %arg5[%c0_4, %c0_5], %6 {strides = array<i32>} : memref<128x256xbf16, #tpu.memory_space<vmem>>, vector<128x256xbf16>,
    return
  }
  func.func @transform_0(%arg0: i32, %arg1: i32) -> (i32, i32) {
    %c0_i32 = arith.constant 0 : i32
    %c0_i32_0 = arith.constant 0 : i32
    return %arg0, %c0_i32 : i32, i32
  }
  func.func @transform_1(%arg0: i32, %arg1: i32) -> (i32, i32) {
    %c0_i32 = arith.constant 0 : i32
    %c0_i32_0 = arith.constant 0 : i32
    %c0_i32_1 = arith.constant 0 : i32
    return %c0_i32, %c0_i32_0 : i32, i32
  }
  func.func @transform_2(%arg0: i32, %arg1: i32) -> (i32, i32) {
    %c0_i32 = arith.constant 0 : i32
    %c0_i32_0 = arith.constant 0 : i32
    return %c0_i32, %arg1 : i32, i32
  }
  func.func @transform_3(%arg0: i32, %arg1: i32) -> (i32, i32) {
    %c0_i32 = arith.constant 0 : i32
    return %arg0, %arg1 : i32, i32
  }
}

</mosaic_0001>

<bundles_post_ra>
// kernel: tpu_custom_call.1
= control target key start
LH: loop header
LB: loop body
LE: loop exit
PB: predicated region body
PF: predicated region fallthrough
CT: control target
= control target key end

     0   :  { %s2236_s0 = inlined_call_operand.hbm [shape: f32[128,256], index: 0, kind: input, shape index: {}]   ;;  %s2237_s1 = inlined_call_operand.hbm [shape: f32[1,256], index: 1, kind: input, shape index: {}]   ;;  %s2238_s2 = inlined_call_operand.hbm [shape: bf16[256,768], index: 2, kind: input, shape index: {}]   ;;  %s2239_s3 = inlined_call_operand.hbm [shape: bf16[128,768], index: 3, kind: output, shape index: {}]  }
   0x1   :  { %2243 = sst [smem:[#allocation14_spill]] %s2236_s0 }
   0x2   :  { %8 = vsyncpa [#allocation4], 0 }
   0x3   :  { %9 = vsyncpa [#allocation7], 0 }
   0x4   :  { %10 = vsyncpa [#allocation5], 0 }
   0x5   :  { %12 = vsyncpa [#allocation5 + $0x1], 0  ;;  %s1783_s12 = smov 0   ;;  %s1785_s13 = smov 0  }
   0x6   :  { %s1787_s14 = smov 0   ;;  %s1789_s15 = smov 0  }
   0x7   :  { %s1791_s16 = smov 0   ;;  %s1793_s17 = smov 0  }
   0x8 LB: > { %s1814_s18 = sadd.s32 4294967295, %s1749_s17   ;;  %s1230_s19 = sadd.s32 4294967294, %s1749_s17   ;;  %s1749_s17 = sphi %s1793_s17, %s18_s17   ;;  %s1745_s16 = sphi %s1791_s16, %s2263_s16   ;;  %s1741_s15 = sphi %s1789_s15, %s2262_s15   ;;  %s1737_s14 = sphi %s1787_s14, %s2261_s14   ;;  %s1733_s13 = sphi %s1785_s13, %s2260_s13   ;;  %s1729_s12 = sphi %s1783_s12, %s2259_s12  }
   0x9   : > { %s84_s20 = sadd.s32 1, %s1737_s14  ;;  %p91_p0 = scmp.ne.s32.totalorder %s1737_s14, %s1733_s13 }
   0xa   : > { %p92_p1 = scmp.eq.s32.totalorder %s1749_s17, 0  ;;  %p97_p2 = scmp.ne.s32.totalorder %s1733_s13, %s1729_s12 }
   0xb   : > { %p2240_p3 = scmp.eq.s32.totalorder %s1814_s18, 0  ;;  %p123_p4 = scmp.eq.s32.totalorder %s1814_s18, 2 }
   0xc   : > { %p1825_p5 = por %p92_p1, %p91_p0  ;;  %p129_p6 = scmp.eq.s32.totalorder %s1230_s19, 2 }
   0xd   : > { %p1831_p7 = por %p2240_p3, %p97_p2  ;;  %p1835_p8 = por %p123_p4, %p91_p0 }
   0xe   : > { %p1839_p9 = por %p129_p6, %p97_p2  ;;  %p1231_p10 = scmp.ge.s32.totalorder %s1749_s17, 1 }
   0xf   : > { %s2245_s22 = scalar_select %p1831_p7, 1, 0 }
  0x10   : > { %s2246_s23 = scalar_select %p1835_p8, 1, 0 }
  0x11   : > { %s2247_s24 = scalar_select %p1839_p9, 1, 0 }
  0x12   : > { %p136_p11 = scmp.lt.s32.totalorder %s1749_s17, 4  ;;  %s1751_s26 = smov [#allocation3]  }
  0x13   : > { %s152_s27 = sshll.u32 %s1751_s26, 4  ;;  %p1424_p0 = scmp.lt.s32.totalorder %s1749_s17, 3  ;;  %s153_s27 = int_to_ptr.vmem [resolvable:$true] %s152_s27 }
  0x14   : > { %p1845_p12 = pnand %p1231_p10, %p136_p11  ;;  %s1752_s29 = smov [#allocation6]  }
  0x15   : > { %s166_s30 = sshll.u32 %s1752_s29, 4  ;;  %p1860_p2 = pnand %p1424_p0, %p1825_p5  ;;  %s167_s30 = int_to_ptr.vmem [resolvable:$true] %s166_s30 }
  0x16   : > { %p1407_p13 = pneg %p1845_p12  ;;  %s1592_s5 = scalar_lea.vmem %s153_s27, 4096 }
  0x17   : > { %p1593_p6 = scmp.ne.s32.totalorder %s153_s27, %s1592_s5 }
  0x18   : > { %p1854_p1 = pnand %p1407_p13, %p2240_p3  ;;  %p1600_p13 = scmp.lt.s32.totalorder %s153_s27, %s153_s27 }
  0x19   : > { %p1601_p3 = scmp.lt.s32.totalorder %s1592_s5, %s1592_s5 }
  0x1a   : > { %p1583_p4 = pneg %p1854_p1 }
  0x1b   : > { %p1602_p9 = por %p1601_p3, %p1600_p13 }
  0x1c   : > { %p1595_p10 = pnand %p1593_p6, %p1583_p4 }
  0x1e   : > { %p1596_p11 = pneg %p1595_p10 }
  0x20   : > { %p1603_p8 = pnand %p1602_p9, %p1596_p11 }
  0x22   : > { %1606 = shalt.err (!%p1603_p8)
}
  0x23   : > { %s1753_s6 = smov 256   ;;  %s1754_s7 = smov 16  }
  0x24   : > { %s2251_s0 = sld [smem:[#allocation14_spill]]  ;;  %s1618_s10 = scalar_lea.vmem %s167_s30, 32 }
  0x25   : > { %p1619_p5 = scmp.ne.s32.totalorder %s167_s30, %s1618_s10  ;;  %p1626_p10 = scmp.lt.s32.totalorder %s167_s30, %s167_s30 }
  0x26   : > { %p1627_p7 = scmp.lt.s32.totalorder %s1618_s10, %s1618_s10 }
  0x27   : > { %p1621_p0 = pnand %p1619_p5, %p1583_p4 }
  0x28   : > { %p1628_p3 = por %p1627_p7, %p1626_p10 }
  0x29   : > { %p1622_p6 = pneg %p1621_p0 }
  0x2a   : > { %1410 = dma.hbm_to_vmem [thread:$0]  (!%p1854_p1), %s2251_s0, 4096, %s153_s27, [#allocation4], %s1753_s6, %s1753_s6, %s1754_s7  }
  0x2b   : > { %p1629_p9 = pnand %p1628_p3, %p1622_p6 }
  0x2d   : > { %1632 = shalt.err (!%p1629_p9)
}
  0x2e   : > { %1413 = dma.hbm_to_vmem [thread:$0]  (!%p1854_p1), %s2237_s1, 32, %s167_s30, [#allocation7]  }
  0x2f   : > { %s27_s21 = sadd.s32 1, %s1745_s16  ;;  %s177_s26 = sand.u32 1, %s1749_s17  }
  0x30   : > { %p28_p8 = scmp.ge.s32.totalorder %s27_s21, 3  ;;  %s179_s27 = sand.u32 1, %s1737_s14  }
  0x31   : > { %s1329_s29 = sshll.u32 %s1745_s16, 7  ;;  %s1235_s28 = sshll.u32 %s179_s27, 8 }
  0x32   : > { %s2265_s21 = smov (%p28_p8, %s27_s21), 0  ;;  %s1891_s7 = scalar_lea.hbm %s2238_s2, %s1329_s29 }
  0x33   : > { %s81_s8 = ssub.s32 %s1745_s16, %s2265_s21  ;;  %s181_s9 = scalar_lea.vmem [#allocation8], %s1235_s28 }
  0x34   : > { %p82_p7 = scmp.eq.s32.totalorder %s81_s8, 0  ;;  %s188_s10 = sshll.u32 %s181_s9, 4  ;;  %s189_s10 = int_to_ptr.vmem [resolvable:$true] %s188_s10 }
  0x35   : > { %s178_s11 = scalar_lea.sflag [#allocation4], %s177_s26  ;;  %p1635_p1 = pneg %p1860_p2 }
  0x36   : > { %s1898_s30 = scalar_select %p82_p7, %s1737_s14, %s84_s20  }
  0x37   : > { %s1646_s19 = scalar_lea.vmem %s189_s10, 4096  ;;  %s1755_s27 = smov [#allocation8]  }
  0x38   : > { %p1647_p4 = scmp.ne.s32.totalorder %s189_s10, %s1646_s19  ;;  %s1651_s0 = sshll.u32 %s1755_s27, 4  ;;  %s1652_s0 = int_to_ptr.vmem [resolvable:$false] %s1651_s0 }
  0x39   : > { %s1653_s29 = scalar_lea.vmem %s1652_s0, 8192  ;;  %p1654_p5 = scmp.lt.s32.totalorder %s189_s10, %s1652_s0 }
  0x3a   : > { %p1649_p11 = pnand %p1647_p4, %p1635_p1  ;;  %p1655_p0 = scmp.lt.s32.totalorder %s1653_s29, %s1646_s19 }
  0x3c   : > { %p1650_p13 = pneg %p1649_p11  ;;  %p1656_p6 = por %p1655_p0, %p1654_p5 }
  0x3e   : > { %p1657_p10 = pnand %p1656_p6, %p1650_p13 }
  0x40   : > { %1660 = shalt.err (!%p1657_p10)
}
  0x41   : > { %s1756_s28 = smov 384   ;;  %s1757_s20 = smov 128  }
  0x42   : > { %s1758_s26 = smov 8   ;;  %200 = sbr.rel (%p1845_p12) target bundleno = 589 (0x24d), region = 32 }
  0x43   : > { %1417 = dma.hbm_to_vmem [thread:$0]  (!%p1860_p2), %s1891_s7, 4096, %s189_s10, %s178_s11, %s1756_s28, %s1757_s20, %s1758_s26  }
  0x44   : > { %p2252_p3 = scmp.eq.s32.totalorder (!%p1845_p12), %s1814_s18, 0 }
  0x47   : > { %1712 = dma.done.wait (%p2252_p3), [#allocation4], 4096   ;;  %p2253_p9 = pmov %p2252_p3 }
  0x48   : > { %p2254_p8 = pmov %p2252_p3 }
  0x49   : > { %1714 = vsyncadd (%p2253_p9), [#allocation4], 4294963200 }
  0x4a   : > { %1716 = dma.done.wait (%p2254_p8), [#allocation7], 32   ;;  %p2255_p7 = pmov %p2252_p3 }
  0x4b   : > { %s210_s0 = sand.u32 1, %s1814_s18   ;;  %s1917_s4 = sand.u32 1, %s1733_s13  }
  0x4c   : > { %1718 = vsyncadd (%p2255_p7), [#allocation7], 4294967264  ;;  %s1241_s25 = sshll.u32 %s1917_s4, 8  ;;  %s211_s5 = scalar_lea.sflag [#allocation4], %s210_s0 }
  0x4d   : > { %s1920_s6 = scalar_lea.vmem [#allocation8], %s1241_s25  ;;  %p2256_p12 = scmp.ne.s32.totalorder %s2245_s22, 0 }
  0x4f   : > { %1720 = dma.done.wait (%p2256_p12), %s211_s5, 4096  }
  0x50   : > { %1722 = vsyncadd (%p2256_p12), %s211_s5, 4294963200  ;;  %s1242_s7 = sshll.u32 %s1917_s4, 7  ;;  %p1243_p2 = scmp.ne.s32.totalorder %s1741_s15, 0 }
  0x51   : > { %s1927_s8 = scalar_lea.vmem [#allocation9], %s1242_s7 }
  0x52   : > { %244 = sbr.rel (%p1243_p2) target bundleno = 284 (0x11c), region = 48 }
  0x57   : > { %v1930_v0 = vld [vmem:[#allocation3 + $0x20] sm:$0xff]  ;;  %v1932_v1 = vld [vmem:[#allocation3 + $0x28] sm:$0xff]  ;;  %v1944_v7 = vld [vmem:[#allocation3 + $0x30] sm:$0xff] }
  0x58   : > { %v1934_v2 = vld [vmem:[#allocation3] sm:$0xff]  ;;  %v281_v3 = vmul.f32 %v1930_v0, %v1930_v0  ;;  %v282_v4 = vmul.f32 %v1932_v1, %v1932_v1  ;;  %v1940_v5 = vld [vmem:[#allocation3 + $0x8] sm:$0xff]  ;;  %v1946_v8 = vld [vmem:[#allocation3 + $0x38] sm:$0xff]  ;;  %v283_v10 = vmul.f32 %v1944_v7, %v1944_v7 }
  0x59   : > { %v277_v6 = vmul.f32 %v1934_v2, %v1934_v2  ;;  %v278_v9 = vmul.f32 %v1940_v5, %v1940_v5  ;;  %v284_v11 = vmul.f32 %v1946_v8, %v1946_v8  ;;  %v1954_v12 = vld [vmem:[#allocation3 + $0x10] sm:$0xff]  ;;  %v1956_v13 = vld [vmem:[#allocation3 + $0x18] sm:$0xff]  ;;  %v1966_v19 = vld [vmem:[#allocation3 + $0x40] sm:$0xff] }
  0x5a   : > { %v1958_v14 = vld [vmem:[#allocation3 + $0x50] sm:$0xff]  ;;  %v315_v15 = vadd.f32 %v282_v4, %v281_v3  ;;  %v279_v16 = vmul.f32 %v1954_v12, %v1954_v12  ;;  %v280_v17 = vmul.f32 %v1956_v13, %v1956_v13  ;;  %v1964_v18 = vld [vmem:[#allocation3 + $0x58] sm:$0xff]  ;;  %v1968_v20 = vld [vmem:[#allocation3 + $0x48] sm:$0xff]  ;;  %v285_v26 = vmul.f32 %v1966_v19, %v1966_v19 }
  0x5b   : > { %v309_v21 = vadd.f32 %v278_v9, %v277_v6  ;;  %v318_v22 = vadd.f32 %v284_v11, %v283_v10  ;;  %v287_v23 = vmul.f32 %v1958_v14, %v1958_v14  ;;  %v288_v24 = vmul.f32 %v1964_v18, %v1964_v18  ;;  %v1978_v28 = vld [vmem:[#allocation3 + $0x70] sm:$0xff]  ;;  %v1980_v29 = vld [vmem:[#allocation3 + $0x78] sm:$0xff]  ;;  %v1982_v30 = vld [vmem:[#allocation3 + $0x60] sm:$0xff] }
  0x5c   : > { %316 = vadd.xlane.f32.xlu1 %v315_v15  ;;  %v312_v25 = vadd.f32 %v280_v17, %v279_v16  ;;  %v286_v27 = vmul.f32 %v1968_v20, %v1968_v20  ;;  %v1984_v31 = vld [vmem:[#allocation3 + $0x68] sm:$0xff]  ;;  %v291_v33 = vmul.f32 %v1978_v28, %v1978_v28  ;;  %v292_v34 = vmul.f32 %v1980_v29, %v1980_v29  ;;  %v1994_v38 = vld [vmem:[#allocation3 + $0x90] sm:$0xff]  ;;  %v1996_v39 = vld [vmem:[#allocation3 + $0x98] sm:$0xff] }
  0x5d   : > { %310 = vadd.xlane.f32.xlu0 %v309_v21  ;;  %v324_v32 = vadd.f32 %v288_v24, %v287_v23  ;;  %v289_v36 = vmul.f32 %v1982_v30, %v1982_v30  ;;  %v290_v37 = vmul.f32 %v1984_v31, %v1984_v31  ;;  %v1998_v40 = vld [vmem:[#allocation3 + $0x80] sm:$0xff]  ;;  %v2000_v41 = vld [vmem:[#allocation3 + $0x88] sm:$0xff]  ;;  %v295_v43 = vmul.f32 %v1994_v38, %v1994_v38  ;;  %v2010_v48 = vld [vmem:[#allocation3 + $0xb0] sm:$0xff] }
  0x5e   : > { %v321_v35 = vadd.f32 %v286_v27, %v285_v26  ;;  %v330_v42 = vadd.f32 %v292_v34, %v291_v33  ;;  %v296_v44 = vmul.f32 %v1996_v39, %v1996_v39  ;;  %v293_v46 = vmul.f32 %v1998_v40, %v1998_v40  ;;  %v2012_v49 = vld [vmem:[#allocation3 + $0xb8] sm:$0xff]  ;;  %v2014_v50 = vld [vmem:[#allocation3 + $0xa0] sm:$0xff]  ;;  %v2016_v51 = vld [vmem:[#allocation3 + $0xa8] sm:$0xff] }
  0x5f   : > { %v327_v45 = vadd.f32 %v290_v37, %v289_v36  ;;  %v294_v47 = vmul.f32 %v2000_v41, %v2000_v41  ;;  %v299_v53 = vmul.f32 %v2010_v48, %v2010_v48  ;;  %v300_v54 = vmul.f32 %v2012_v49, %v2012_v49  ;;  %v2026_v58 = vld [vmem:[#allocation3 + $0xd0] sm:$0xff]  ;;  %v2028_v59 = vld [vmem:[#allocation3 + $0xd8] sm:$0xff]  ;;  %v2030_v60 = vld [vmem:[#allocation3 + $0xc0] sm:$0xff] }
  0x60   : > { %319 = vadd.xlane.f32.xlu1 %v318_v22  ;;  %v336_v52 = vadd.f32 %v296_v44, %v295_v43  ;;  %v297_v56 = vmul.f32 %v2014_v50, %v2014_v50  ;;  %v298_v57 = vmul.f32 %v2016_v51, %v2016_v51  ;;  %v2032_v61 = vld [vmem:[#allocation3 + $0xc8] sm:$0xff]  ;;  %v303_v63 = vmul.f32 %v2026_v58, %v2026_v58  ;;  %v2042_v10 = vld [vmem:[#allocation3 + $0xf0] sm:$0xff]  ;;  %v2044_v11 = vld [vmem:[#allocation3 + $0xf8] sm:$0xff] }
  0x61   : > { %313 = vadd.xlane.f32.xlu0 %v312_v25  ;;  %v333_v55 = vadd.f32 %v294_v47, %v293_v46  ;;  %v342_v62 = vadd.f32 %v300_v54, %v299_v53  ;;  %v304_v3 = vmul.f32 %v2028_v59, %v2028_v59  ;;  %v301_v6 = vmul.f32 %v2030_v60, %v2030_v60  ;;  %v2046_v15 = vld [vmem:[#allocation3 + $0xe0] sm:$0xff]  ;;  %v2048_v16 = vld [vmem:[#allocation3 + $0xe8] sm:$0xff] }
  0x62   : > { %v339_v4 = vadd.f32 %v298_v57, %v297_v56  ;;  %v302_v9 = vmul.f32 %v2032_v61, %v2032_v61  ;;  %v307_v21 = vmul.f32 %v2042_v10, %v2042_v10  ;;  %v308_v22 = vmul.f32 %v2044_v11, %v2044_v11 }
  0x63   : > { %v348_v17 = vadd.f32 %v304_v3, %v303_v63  ;;  %v305_v24 = vmul.f32 %v2046_v15, %v2046_v15  ;;  %v306_v25 = vmul.f32 %v2048_v16, %v2048_v16  ;;  %v440_v43 = vlaneseq }
  0x64   : > { %325 = vadd.xlane.f32.xlu1 %v324_v32  ;;  %v345_v23 = vadd.f32 %v302_v9, %v301_v6  ;;  %v354_v26 = vadd.f32 %v308_v22, %v307_v21  ;;  %v438_v21 = vld [vmem:[#allocation6] sm:$0x3] }
  0x65   : > { %322 = vadd.xlane.f32.xlu0 %v321_v35  ;;  %v351_v27 = vadd.f32 %v306_v25, %v305_v24  ;;  %v441_v54 = vshrl.u32 %v440_v43, 7 }
  0x67   : > { %v446_v6 = vsub.s32 1, %v441_v54 }
  0x68   : > { %331 = vadd.xlane.f32.xlu1 %v330_v42 }
  0x69   : > { %328 = vadd.xlane.f32.xlu0 %v327_v45 }
  0x6c   : > { %337 = vadd.xlane.f32.xlu1 %v336_v52 }
  0x6d   : > { %334 = vadd.xlane.f32.xlu0 %v333_v55 }
  0x70   : > { %343 = vadd.xlane.f32.xlu1 %v342_v62 }
  0x71   : > { %340 = vadd.xlane.f32.xlu0 %v339_v4  ;;  %v442_v4 = vsub.s32 0, %v441_v54 }
  0x74   : > { %349 = vadd.xlane.f32.xlu1 %v348_v17 }
  0x75   : > { %346 = vadd.xlane.f32.xlu0 %v345_v23 }
  0x78   : > { %355 = vadd.xlane.f32.xlu1 %v354_v26  ;;  %v2058_v26 = vrot.slane %v438_v21, %v442_v4 }
  0x79   : > { %352 = vadd.xlane.f32.xlu0 %v351_v27  ;;  %v2060_v27 = vrot.slane %v438_v21, %v446_v6 }
  0xe5   : > { %v317_v32 = vpop.xlane.xlu1 %316 }
  0xe6   : > { %v360_v33 = vmul.f32 0.00390625, %v317_v32  ;;  %v311_v34 = vpop.xlane.xlu0 %310 }
  0xe7   : > { %v358_v35 = vmul.f32 0.00390625, %v311_v34 }
  0xe8   : > { %v376_v36 = vadd.f32 1e-05, %v360_v33 }
  0xe9   : > { %v374_v37 = vadd.f32 1e-05, %v358_v35  ;;  %v320_v42 = vpop.xlane.xlu1 %319 }
  0xea   : > { %1486 = vrsqrt.f32 %v376_v36  ;;  %v361_v44 = vmul.f32 0.00390625, %v320_v42  ;;  %v314_v45 = vpop.xlane.xlu0 %313 }
  0xeb   : > { %1488 = vrsqrt.f32 %v374_v37  ;;  %v359_v46 = vmul.f32 0.00390625, %v314_v45 }
  0xec   : > { %v377_v47 = vadd.f32 1e-05, %v361_v44 }
  0xed   : > { %v375_v52 = vadd.f32 1e-05, %v359_v46  ;;  %v326_v53 = vpop.xlane.xlu1 %325 }
  0xee   : > { %1490 = vrsqrt.f32 %v377_v47  ;;  %v363_v55 = vmul.f32 0.00390625, %v326_v53  ;;  %v323_v56 = vpop.xlane.xlu0 %322 }
  0xef   : > { %1492 = vrsqrt.f32 %v375_v52  ;;  %v362_v57 = vmul.f32 0.00390625, %v323_v56 }
  0xf0   : > { %v379_v62 = vadd.f32 1e-05, %v363_v55 }
  0xf1   : > { %v378_v63 = vadd.f32 1e-05, %v362_v57  ;;  %v332_v3 = vpop.xlane.xlu1 %331 }
  0xf2   : > { %1494 = vrsqrt.f32 %v379_v62  ;;  %v365_v9 = vmul.f32 0.00390625, %v332_v3  ;;  %v329_v17 = vpop.xlane.xlu0 %328 }
  0xf3   : > { %1496 = vrsqrt.f32 %v378_v63  ;;  %v364_v22 = vmul.f32 0.00390625, %v329_v17 }
  0xf4   : > { %v381_v23 = vadd.f32 1e-05, %v365_v9 }
  0xf5   : > { %v380_v24 = vadd.f32 1e-05, %v364_v22  ;;  %v338_v25 = vpop.xlane.xlu1 %337 }
  0xf6   : > { %1498 = vrsqrt.f32 %v381_v23  ;;  %v367_v32 = vmul.f32 0.00390625, %v338_v25  ;;  %v335_v33 = vpop.xlane.xlu0 %334 }
  0xf7   : > { %v1487_v34 = vpop.eup %1486  ;;  %1500 = vrsqrt.f32 %v380_v24  ;;  %v366_v35 = vmul.f32 0.00390625, %v335_v33 }
  0xf8   : > { %v1489_v36 = vpop.eup %1488  ;;  %v410_v37 = vmul.f32 %v1487_v34, %v1930_v0  ;;  %v411_v42 = vmul.f32 %v1487_v34, %v1932_v1  ;;  %v383_v43 = vadd.f32 1e-05, %v367_v32 }
  0xf9   : > { %v406_v44 = vmul.f32 %v1489_v36, %v1934_v2  ;;  %v407_v45 = vmul.f32 %v1489_v36, %v1940_v5  ;;  %v382_v46 = vadd.f32 1e-05, %v366_v35  ;;  %v344_v47 = vpop.xlane.xlu1 %343 }
  0xfa   : > { %v454_v52 = vmul.f32 %v2058_v26, %v410_v37  ;;  %v455_v53 = vmul.f32 %v2060_v27, %v411_v42  ;;  %1502 = vrsqrt.f32 %v383_v43  ;;  %v369_v54 = vmul.f32 0.00390625, %v344_v47  ;;  %v341_v55 = vpop.xlane.xlu0 %340 }
  0xfb   : > { %v1491_v56 = vpop.eup %1490  ;;  %v450_v57 = vmul.f32 %v2058_v26, %v406_v44  ;;  %v451_v0 = vmul.f32 %v2060_v27, %v407_v45  ;;  %1504 = vrsqrt.f32 %v382_v46  ;;  %v368_v1 = vmul.f32 0.00390625, %v341_v55 }
  0xfc   : > { %v1493_v62 = vpop.eup %1492  ;;  %v1332_v2 = vpack.c.bf16 %v455_v53, %v454_v52  ;;  %v412_v5 = vmul.f32 %v1491_v56, %v1944_v7  ;;  %v413_v63 = vmul.f32 %v1491_v56, %v1946_v8  ;;  %v385_v3 = vadd.f32 1e-05, %v369_v54 }
  0xfd   : > { %v1330_v4 = vpack.c.bf16 %v451_v0, %v450_v57  ;;  %v408_v6 = vmul.f32 %v1493_v62, %v1954_v12  ;;  %v409_v9 = vmul.f32 %v1493_v62, %v1956_v13  ;;  %v384_v17 = vadd.f32 1e-05, %v368_v1  ;;  %v350_v21 = vpop.xlane.xlu1 %349 }
  0xfe   : > { %580 = vst [vmem:[#allocation2 + $0x58] sm:$0xff] %v1332_v2  ;;  %v456_v22 = vmul.f32 %v2058_v26, %v412_v5  ;;  %v457_v23 = vmul.f32 %v2060_v27, %v413_v63  ;;  %1506 = vrsqrt.f32 %v385_v3  ;;  %v371_v24 = vmul.f32 0.00390625, %v350_v21  ;;  %v347_v25 = vpop.xlane.xlu0 %346 }
  0xff   : > { %v1495_v32 = vpop.eup %1494  ;;  %578 = vst [vmem:[#allocation2 + $0x30] sm:$0xff] %v1330_v4  ;;  %v452_v7 = vmul.f32 %v2058_v26, %v408_v6  ;;  %v453_v8 = vmul.f32 %v2060_v27, %v409_v9  ;;  %1508 = vrsqrt.f32 %v384_v17  ;;  %v370_v12 = vmul.f32 0.00390625, %v347_v25 }
 0x100   : > { %v1497_v33 = vpop.eup %1496  ;;  %v1333_v13 = vpack.c.bf16 %v457_v23, %v456_v22  ;;  %v416_v34 = vmul.f32 %v1495_v32, %v1958_v14  ;;  %v417_v35 = vmul.f32 %v1495_v32, %v1964_v18  ;;  %v387_v36 = vadd.f32 1e-05, %v371_v24 }
 0x101   : > { %v1331_v37 = vpack.c.bf16 %v453_v8, %v452_v7  ;;  %v414_v42 = vmul.f32 %v1497_v33, %v1966_v19  ;;  %v415_v43 = vmul.f32 %v1497_v33, %v1968_v20  ;;  %v386_v44 = vadd.f32 1e-05, %v370_v12  ;;  %v356_v45 = vpop.xlane.xlu1 %355 }
 0x102   : > { %581 = vst [vmem:[#allocation2 + $0x18] sm:$0xff] %v1333_v13  ;;  %v460_v46 = vmul.f32 %v2058_v26, %v416_v34  ;;  %v461_v47 = vmul.f32 %v2060_v27, %v417_v35  ;;  %1510 = vrsqrt.f32 %v387_v36  ;;  %v373_v52 = vmul.f32 0.00390625, %v356_v45  ;;  %v353_v53 = vpop.xlane.xlu0 %352 }
 0x103   : > { %v1499_v54 = vpop.eup %1498  ;;  %579 = vst [vmem:[#allocation2] sm:$0xff] %v1331_v37  ;;  %v458_v14 = vmul.f32 %v2058_v26, %v414_v42  ;;  %v459_v18 = vmul.f32 %v2060_v27, %v415_v43  ;;  %1512 = vrsqrt.f32 %v386_v44  ;;  %v372_v19 = vmul.f32 0.00390625, %v353_v53 }
 0x104   : > { %v1501_v55 = vpop.eup %1500  ;;  %v1335_v20 = vpack.c.bf16 %v461_v47, %v460_v46  ;;  %v420_v56 = vmul.f32 %v1499_v54, %v1978_v28  ;;  %v421_v57 = vmul.f32 %v1499_v54, %v1980_v29  ;;  %v389_v0 = vadd.f32 1e-05, %v373_v52 }
 0x105   : > { %v1334_v1 = vpack.c.bf16 %v459_v18, %v458_v14  ;;  %v418_v62 = vmul.f32 %v1501_v55, %v1982_v30  ;;  %v419_v2 = vmul.f32 %v1501_v55, %v1984_v31  ;;  %v388_v5 = vadd.f32 1e-05, %v372_v19 }
 0x106   : > { %583 = vst [vmem:[#allocation2 + $0x68] sm:$0xff] %v1335_v20  ;;  %v464_v63 = vmul.f32 %v2058_v26, %v420_v56  ;;  %v465_v3 = vmul.f32 %v2060_v27, %v421_v57  ;;  %1514 = vrsqrt.f32 %v389_v0 }
 0x107   : > { %v1503_v4 = vpop.eup %1502  ;;  %582 = vst [vmem:[#allocation2 + $0x50] sm:$0xff] %v1334_v1  ;;  %v462_v6 = vmul.f32 %v2058_v26, %v418_v62  ;;  %v463_v28 = vmul.f32 %v2060_v27, %v419_v2  ;;  %1516 = vrsqrt.f32 %v388_v5 }
 0x108   : > { %v1505_v29 = vpop.eup %1504  ;;  %v1337_v9 = vpack.c.bf16 %v465_v3, %v464_v63  ;;  %v424_v30 = vmul.f32 %v1503_v4, %v1994_v38  ;;  %v425_v31 = vmul.f32 %v1503_v4, %v1996_v39 }
 0x109   : > { %v1336_v17 = vpack.c.bf16 %v463_v28, %v462_v6  ;;  %v422_v21 = vmul.f32 %v1505_v29, %v1998_v40  ;;  %v423_v22 = vmul.f32 %v1505_v29, %v2000_v41 }
 0x10a   : > { %585 = vst [vmem:[#allocation2 + $0x48] sm:$0xff] %v1337_v9  ;;  %v468_v23 = vmul.f32 %v2058_v26, %v424_v30  ;;  %v469_v24 = vmul.f32 %v2060_v27, %v425_v31 }
 0x10b   : > { %v1507_v25 = vpop.eup %1506  ;;  %584 = vst [vmem:[#allocation2 + $0x8] sm:$0xff] %v1336_v17  ;;  %v466_v32 = vmul.f32 %v2058_v26, %v422_v21  ;;  %v467_v7 = vmul.f32 %v2060_v27, %v423_v22 }
 0x10c   : > { %v1509_v8 = vpop.eup %1508  ;;  %v1339_v38 = vpack.c.bf16 %v469_v24, %v468_v23  ;;  %v428_v39 = vmul.f32 %v1507_v25, %v2010_v48  ;;  %v429_v12 = vmul.f32 %v1507_v25, %v2012_v49 }
 0x10d   : > { %v1338_v40 = vpack.c.bf16 %v467_v7, %v466_v32  ;;  %v426_v41 = vmul.f32 %v1509_v8, %v2014_v50  ;;  %v427_v33 = vmul.f32 %v1509_v8, %v2016_v51 }
 0x10e   : > { %587 = vst [vmem:[#allocation2 + $0x20] sm:$0xff] %v1339_v38  ;;  %v472_v13 = vmul.f32 %v2058_v26, %v428_v39  ;;  %v473_v34 = vmul.f32 %v2060_v27, %v429_v12 }
 0x10f   : > { %v1511_v35 = vpop.eup %1510  ;;  %586 = vst [vmem:[#allocation2 + $0x40] sm:$0xff] %v1338_v40  ;;  %v470_v36 = vmul.f32 %v2058_v26, %v426_v41  ;;  %v471_v37 = vmul.f32 %v2060_v27, %v427_v33 }
 0x110   : > { %v1513_v42 = vpop.eup %1512  ;;  %v1341_v48 = vpack.c.bf16 %v473_v34, %v472_v13  ;;  %v432_v49 = vmul.f32 %v1511_v35, %v2026_v58  ;;  %v433_v43 = vmul.f32 %v1511_v35, %v2028_v59 }
 0x111   : > { %v1340_v50 = vpack.c.bf16 %v471_v37, %v470_v36  ;;  %v430_v51 = vmul.f32 %v1513_v42, %v2030_v60  ;;  %v431_v44 = vmul.f32 %v1513_v42, %v2032_v61 }
 0x112   : > { %589 = vst [vmem:[#allocation2 + $0x38] sm:$0xff] %v1341_v48  ;;  %v476_v45 = vmul.f32 %v2058_v26, %v432_v49  ;;  %v477_v46 = vmul.f32 %v2060_v27, %v433_v43 }
 0x113   : > { %v1515_v47 = vpop.eup %1514  ;;  %588 = vst [vmem:[#allocation2 + $0x10] sm:$0xff] %v1340_v50  ;;  %v474_v52 = vmul.f32 %v2058_v26, %v430_v51  ;;  %v475_v53 = vmul.f32 %v2060_v27, %v431_v44 }
 0x114   : > { %v1517_v54 = vpop.eup %1516  ;;  %v1343_v58 = vpack.c.bf16 %v477_v46, %v476_v45  ;;  %v436_v59 = vmul.f32 %v1515_v47, %v2042_v10  ;;  %v437_v14 = vmul.f32 %v1515_v47, %v2044_v11 }
 0x115   : > { %v1342_v60 = vpack.c.bf16 %v475_v53, %v474_v52  ;;  %v434_v61 = vmul.f32 %v1517_v54, %v2046_v15  ;;  %v435_v18 = vmul.f32 %v1517_v54, %v2048_v16 }
 0x116   : > { %591 = vst [vmem:[#allocation2 + $0x70] sm:$0xff] %v1343_v58  ;;  %v480_v19 = vmul.f32 %v2058_v26, %v436_v59  ;;  %v481_v55 = vmul.f32 %v2060_v27, %v437_v14 }
 0x117   : > { %590 = vst [vmem:[#allocation2 + $0x60] sm:$0xff] %v1342_v60  ;;  %v478_v20 = vmul.f32 %v2058_v26, %v434_v61  ;;  %v479_v56 = vmul.f32 %v2060_v27, %v435_v18 }
 0x118   : > { %v1345_v57 = vpack.c.bf16 %v481_v55, %v480_v19 }
 0x119   : > { %v1344_v0 = vpack.c.bf16 %v479_v56, %v478_v20 }
 0x11a   : > { %593 = vst [vmem:[#allocation2 + $0x28] sm:$0xff] %v1345_v57 }
 0x11b   : > { %592 = vst [vmem:[#allocation2 + $0x78] sm:$0xff] %v1344_v0 }
 0x11c PF: > { %v1518_v10 = vld [vmem:[%s1920_s6 + $0x74] ss:$8 sps:$4 sm:$0xff]   ;;  %v1520_v11 = vld [vmem:[%s1920_s6 + $0x70] ss:$8 sps:$4 sm:$0xff]   ;;  %v1521_v15 = vld [vmem:[%s1920_s6 + $0x64] ss:$8 sps:$4 sm:$0xff]  }
 0x11d   : > { %882 = vmatprep.subr.bf16.mxu0 %v1518_v10  ;;  %1363 = vmatprep.subr.bf16.mxu1 %v1518_v10  ;;  %v1523_v16 = vld [vmem:[%s1920_s6 + $0x60] ss:$8 sps:$4 sm:$0xff]   ;;  %v1524_v26 = vld [vmem:[%s1920_s6 + $0x54] ss:$8 sps:$4 sm:$0xff]   ;;  %v1526_v27 = vld [vmem:[%s1920_s6 + $0x50] ss:$8 sps:$4 sm:$0xff]  }
 0x11e   : > { %883 = vmatpush1.bf16.msra.mxu0 %v1520_v11  ;;  %1379 = vmatpush1.bf16.msra.mxu1 %v1520_v11  ;;  %v1527_v1 = vld [vmem:[%s1920_s6 + $0x44] ss:$8 sps:$4 sm:$0xff]   ;;  %v1529_v62 = vld [vmem:[%s1920_s6 + $0x40] ss:$8 sps:$4 sm:$0xff]   ;;  %v1530_v2 = vld [vmem:[%s1920_s6 + $0x34] ss:$8 sps:$4 sm:$0xff]  }
 0x11f   : > { %884 = vmatprep.subr.bf16.mxu0 %v1521_v15  ;;  %1364 = vmatprep.subr.bf16.mxu1 %v1521_v15  ;;  %v1532_v5 = vld [vmem:[%s1920_s6 + $0x30] ss:$8 sps:$4 sm:$0xff]   ;;  %v1533_v63 = vld [vmem:[%s1920_s6 + $0x24] ss:$8 sps:$4 sm:$0xff]   ;;  %v1535_v3 = vld [vmem:[%s1920_s6 + $0x20] ss:$8 sps:$4 sm:$0xff]  }
 0x120   : > { %v1536_v4 = vld [vmem:[%s1920_s6 + $0x14] ss:$8 sps:$4 sm:$0xff]   ;;  %v1538_v29 = vld [vmem:[%s1920_s6 + $0x10] ss:$8 sps:$4 sm:$0xff]   ;;  %v1539_v30 = vld [vmem:[%s1920_s6 + $0x4] ss:$8 sps:$4 sm:$0xff]  }
 0x121   : > { %v1568_v6 = vld [vmem:[#allocation2 + $0x34] ss:$-48 sps:$4 sm:$0xff]   ;;  %v596_v35 = vld [vmem:[#allocation2 + $0x58] sm:$0xff]  ;;  %v1566_v37 = vld [vmem:[#allocation2 + $0x30] ss:$-48 sps:$4 sm:$0xff]   ;;  %s1362_s18 = sshll.u32 %s1741_s15, 7 }
 0x122   : > { %885 = vmatpush1.bf16.msra.mxu0 %v1523_v16  ;;  %1380 = vmatpush1.bf16.msra.mxu1 %v1523_v16  ;;  %v2139_v28 = vld [vmem:[#allocation2 + $0x40] sm:$0xff]  ;;  %v1544_v22 = vld [vmem:[%s1920_s6 + $0xf0] ss:$8 sps:$4 sm:$0xff]   ;;  %v600_v45 = vld [vmem:[#allocation2 + $0x8] sm:$0xff]  ;;  %s1124_s22 = sshll.u32 %s1927_s8, 4  ;;  %s2185_s11 = scalar_lea.hbm %s2239_s3, %s1362_s18  ;;  %s2187_s22 = int_to_ptr.vmem [resolvable:$true] %s1124_s22 }
 0x123   : > { %886 = vmatprep.subr.bf16.mxu0 %v1524_v26  ;;  %1365 = vmatprep.subr.bf16.mxu1 %v1524_v26  ;;  %v2142_v9 = vld [vmem:[#allocation2 + $0x20] sm:$0xff]  ;;  %v1550_v32 = vld [vmem:[%s1920_s6 + $0xd0] ss:$8 sps:$4 sm:$0xff]   ;;  %v601_v46 = vld [vmem:[#allocation2 + $0x48] sm:$0xff]  ;;  %s1108_s15 = scalar_lea.sflag [#allocation5], %s1917_s4  ;;  %s1661_s19 = scalar_lea.vmem %s2187_s22, 2048 }
 0x124   : > { %v1269_v31 = vcombine.high %v2139_v28, %v2142_v9  ;;  %914 = vmatprep.mubr.bf16.mxu0 %v1568_v6  ;;  %v1541_v17 = vld [vmem:[%s1920_s6] ss:$8 sps:$4 sm:$0xff]   ;;  %v1542_v21 = vld [vmem:[%s1920_s6 + $0xf4] ss:$8 sps:$4 sm:$0xff]   ;;  %v1545_v23 = vld [vmem:[%s1920_s6 + $0xe4] ss:$8 sps:$4 sm:$0xff]   ;;  %v1268_v42 = vcombine.low %v2139_v28, %v2142_v9  ;;  %v1267_v53 = vcombine.high %v600_v45, %v601_v46  ;;  %v1266_v58 = vcombine.low %v600_v45, %v601_v46  ;;  %p1662_p1 = scmp.ne.s32.totalorder %s2187_s22, %s1661_s19 }
 0x125   : > { %v1547_v24 = vld [vmem:[%s1920_s6 + $0xe0] ss:$8 sps:$4 sm:$0xff]   ;;  %v1548_v25 = vld [vmem:[%s1920_s6 + $0xd4] ss:$8 sps:$4 sm:$0xff]   ;;  %v1551_v7 = vld [vmem:[%s1920_s6 + $0xc4] ss:$8 sps:$4 sm:$0xff]  }
 0x126   : > { %887 = vmatpush1.bf16.msra.mxu0 %v1526_v27  ;;  %1381 = vmatpush1.bf16.msra.mxu1 %v1526_v27  ;;  %v1553_v8 = vld [vmem:[%s1920_s6 + $0xc0] ss:$8 sps:$4 sm:$0xff]   ;;  %v1554_v38 = vld [vmem:[%s1920_s6 + $0xb4] ss:$8 sps:$4 sm:$0xff]   ;;  %v1556_v39 = vld [vmem:[%s1920_s6 + $0xb0] ss:$8 sps:$4 sm:$0xff]  }
 0x127   : > { %888 = vmatprep.subr.bf16.mxu0 %v1527_v1  ;;  %1366 = vmatprep.subr.bf16.mxu1 %v1527_v1  ;;  %v1557_v12 = vld [vmem:[%s1920_s6 + $0xa4] ss:$8 sps:$4 sm:$0xff]   ;;  %v1559_v40 = vld [vmem:[%s1920_s6 + $0xa0] ss:$8 sps:$4 sm:$0xff]   ;;  %v1560_v41 = vld [vmem:[%s1920_s6 + $0x94] ss:$8 sps:$4 sm:$0xff]  }
 0x128   : > { %954 = vmatprep.mubr.bf16.mxu1 %v1269_v31  ;;  %v1562_v33 = vld [vmem:[%s1920_s6 + $0x90] ss:$8 sps:$4 sm:$0xff]   ;;  %v1563_v13 = vld [vmem:[%s1920_s6 + $0x84] ss:$8 sps:$4 sm:$0xff]   ;;  %v1565_v34 = vld [vmem:[%s1920_s6 + $0x80] ss:$8 sps:$4 sm:$0xff]  }
 0x129   : > { %v597_v36 = vld [vmem:[#allocation2 + $0x18] sm:$0xff]  ;;  %v1572_v51 = vld [vmem:[#allocation2 + $0x54] ss:$24 sps:$4 sm:$0xff]   ;;  %v1576_v47 = vld [vmem:[#allocation2 + $0x50] ss:$24 sps:$4 sm:$0xff]   ;;  %p2257_p4 = scmp.ne.s32.totalorder %s2246_s23, 0 }
 0x12a   : > { %889 = vmatpush1.bf16.msra.mxu0 %v1529_v62  ;;  %1382 = vmatpush1.bf16.msra.mxu1 %v1529_v62  ;;  %v1263_v48 = vcombine.high %v596_v35, %v597_v36  ;;  %v1569_v49 = vld [vmem:[#allocation2 + $0x14] ss:$40 sps:$4 sm:$0xff]   ;;  %v1262_v43 = vcombine.low %v596_v35, %v597_v36  ;;  %v1571_v50 = vld [vmem:[#allocation2 + $0x10] ss:$40 sps:$4 sm:$0xff]   ;;  %s1759_s27 = smov [#allocation9]  }
 0x12b   : > { %890 = vmatprep.subr.bf16.mxu0 %v1530_v2  ;;  %1367 = vmatprep.subr.bf16.mxu1 %v1530_v2  ;;  %v1574_v44 = vld [vmem:[#allocation2 + $0x64] ss:$16 sps:$4 sm:$0xff]   ;;  %v1577_v52 = vld [vmem:[#allocation2 + $0x60] ss:$16 sps:$4 sm:$0xff]   ;;  %v1578_v54 = vld [vmem:[#allocation2 + $0x7c] ss:$-80 sps:$4 sm:$0xff]   ;;  %p1663_p11 = pnand %p1662_p1, %p2257_p4 }
 0x12c   : > { %v1580_v59 = vld [vmem:[#allocation2 + $0x78] ss:$-80 sps:$4 sm:$0xff]   ;;  %s1665_s29 = sshll.u32 %s1759_s27, 4  ;;  %s1666_s29 = int_to_ptr.vmem [resolvable:$false] %s1665_s29 }
 0x12d   : > { %p1664_p13 = pneg %p1663_p11  ;;  %s1667_s28 = scalar_lea.vmem %s1666_s29, 4096 }
 0x12e   : > { %891 = vmatpush1.bf16.msra.mxu0 %v1532_v5  ;;  %1383 = vmatpush1.bf16.msra.mxu1 %v1532_v5  ;;  %p1668_p5 = scmp.lt.s32.totalorder %s2187_s22, %s1666_s29  ;;  %p1669_p0 = scmp.lt.s32.totalorder %s1667_s28, %s1661_s19 }
 0x12f   : > { %892 = vmatprep.subr.bf16.mxu0 %v1533_v63  ;;  %1368 = vmatprep.subr.bf16.mxu1 %v1533_v63 }
 0x130   : > { %p1670_p6 = por %p1669_p0, %p1668_p5 }
 0x132   : > { %893 = vmatpush1.bf16.msra.mxu0 %v1535_v3  ;;  %1384 = vmatpush1.bf16.msra.mxu1 %v1535_v3  ;;  %p1671_p10 = pnand %p1670_p6, %p1664_p13 }
 0x133   : > { %894 = vmatprep.subr.bf16.mxu0 %v1536_v4  ;;  %1369 = vmatprep.subr.bf16.mxu1 %v1536_v4 }
 0x136   : > { %895 = vmatpush1.bf16.msra.mxu0 %v1538_v29  ;;  %1385 = vmatpush1.bf16.msra.mxu1 %v1538_v29 }
 0x137   : > { %896 = vmatprep.subr.bf16.mxu0 %v1539_v30  ;;  %1370 = vmatprep.subr.bf16.mxu1 %v1539_v30 }
 0x13a   : > { %897 = vmatpush1.bf16.msra.mxu0 %v1541_v17  ;;  %1386 = vmatpush1.bf16.msra.mxu1 %v1541_v17 }
 0x13b   : > { %898 = vmatprep.subr.bf16.mxu0 %v1542_v21  ;;  %1371 = vmatprep.subr.bf16.mxu1 %v1542_v21 }
 0x13e   : > { %899 = vmatpush2.bf16.msra.mxu0 %v1544_v22  ;;  %1387 = vmatpush2.bf16.msra.mxu1 %v1544_v22 }
 0x13f   : > { %900 = vmatprep.subr.bf16.mxu0 %v1545_v23  ;;  %1372 = vmatprep.subr.bf16.mxu1 %v1545_v23 }
 0x142   : > { %901 = vmatpush2.bf16.msra.mxu0 %v1547_v24  ;;  %1388 = vmatpush2.bf16.msra.mxu1 %v1547_v24 }
 0x143   : > { %902 = vmatprep.subr.bf16.mxu0 %v1548_v25  ;;  %1373 = vmatprep.subr.bf16.mxu1 %v1548_v25 }
 0x146   : > { %903 = vmatpush2.bf16.msra.mxu0 %v1550_v32  ;;  %1389 = vmatpush2.bf16.msra.mxu1 %v1550_v32 }
 0x147   : > { %904 = vmatprep.subr.bf16.mxu0 %v1551_v7  ;;  %1374 = vmatprep.subr.bf16.mxu1 %v1551_v7 }
 0x14a   : > { %905 = vmatpush2.bf16.msra.mxu0 %v1553_v8  ;;  %1390 = vmatpush2.bf16.msra.mxu1 %v1553_v8 }
 0x14b   : > { %906 = vmatprep.subr.bf16.mxu0 %v1554_v38  ;;  %1375 = vmatprep.subr.bf16.mxu1 %v1554_v38 }
 0x14e   : > { %907 = vmatpush2.bf16.msra.mxu0 %v1556_v39  ;;  %1391 = vmatpush2.bf16.msra.mxu1 %v1556_v39 }
 0x14f   : > { %908 = vmatprep.subr.bf16.mxu0 %v1557_v12  ;;  %1376 = vmatprep.subr.bf16.mxu1 %v1557_v12 }
 0x152   : > { %909 = vmatpush2.bf16.msra.mxu0 %v1559_v40  ;;  %1392 = vmatpush2.bf16.msra.mxu1 %v1559_v40 }
 0x153   : > { %910 = vmatprep.subr.bf16.mxu0 %v1560_v41  ;;  %1377 = vmatprep.subr.bf16.mxu1 %v1560_v41 }
 0x156   : > { %911 = vmatpush2.bf16.msra.mxu0 %v1562_v33  ;;  %1393 = vmatpush2.bf16.msra.mxu1 %v1562_v33 }
 0x157   : > { %912 = vmatprep.subr.bf16.mxu0 %v1563_v13  ;;  %1378 = vmatprep.subr.bf16.mxu1 %v1563_v13 }
 0x15a   : > { %913 = vmatpush2.bf16.msra.mxu0 %v1565_v34  ;;  %1394 = vmatpush2.bf16.msra.mxu1 %v1565_v34 }
 0x15d   : > { %915 = vmatmul.mubr.bf16.vlgmr.msra.gmra.mxu0 %v1566_v37  ;;  %955 = vmatmul.mubr.bf16.vlgmr.msra.gmra.mxu1 %v1268_v42 }
 0x15e   : > { %924 = vmatprep.mubr.bf16.mxu0 %v1263_v48  ;;  %964 = vmatprep.mubr.bf16.mxu1 %v1569_v49 }
 0x165   : > { %925 = vmatmul.mubr.bf16.gmra.mxu0 %v1262_v43  ;;  %965 = vmatmul.mubr.bf16.gmra.mxu1 %v1571_v50 }
 0x166   : > { %934 = vmatprep.mubr.bf16.mxu0 %v1572_v51  ;;  %974 = vmatprep.mubr.bf16.mxu1 %v1574_v44 }
 0x16d   : > { %935 = vmatmul.mubr.bf16.gmra.mxu0 %v1576_v47  ;;  %975 = vmatmul.mubr.bf16.gmra.mxu1 %v1577_v52 }
 0x16e   : > { %944 = vmatprep.mubr.bf16.mxu0 %v1267_v53  ;;  %984 = vmatprep.mubr.bf16.mxu1 %v1578_v54 }
 0x175   : > { %945 = vmatmul.mubr.bf16.gmra.mxu0 %v1266_v58  ;;  %985 = vmatmul.mubr.bf16.gmra.mxu1 %v1580_v59 }
 0x21d   : > { %v916_v14 = vpop.f32.mrf.mxu0  ;;  %v956_v60 = vpop.f32.mrf.mxu1 }
 0x21f   : > { %v918_v61 = vpop.f32.mrf.mxu0  ;;  %v958_v18 = vpop.f32.mrf.mxu1 }
 0x220   : > { %v1346_v19 = vpack.c.bf16 %v918_v61, %v916_v14  ;;  %v1354_v55 = vpack.c.bf16 %v958_v18, %v956_v60 }
 0x221   : > { %v920_v20 = vpop.f32.mrf.mxu0  ;;  %v960_v56 = vpop.f32.mrf.mxu1 }
 0x222   : > { %1091 = vst [vmem:[%s1927_s8] sm:$0xff] %v1346_v19  ;;  %1099 = vst [vmem:[%s1927_s8 + $0x40] sm:$0xff] %v1354_v55 }
 0x223   : > { %v922_v57 = vpop.f32.mrf.mxu0  ;;  %v962_v0 = vpop.f32.mrf.mxu1 }
 0x224   : > { %v1347_v10 = vpack.c.bf16 %v922_v57, %v920_v20  ;;  %v1355_v11 = vpack.c.bf16 %v962_v0, %v960_v56 }
 0x225   : > { %v926_v15 = vpop.f32.mrf.mxu0  ;;  %v966_v16 = vpop.f32.mrf.mxu1 }
 0x226   : > { %1092 = vst [vmem:[%s1927_s8 + $0x8] sm:$0xff] %v1347_v10  ;;  %1100 = vst [vmem:[%s1927_s8 + $0x48] sm:$0xff] %v1355_v11 }
 0x227   : > { %v928_v26 = vpop.f32.mrf.mxu0  ;;  %v968_v27 = vpop.f32.mrf.mxu1 }
 0x228   : > { %v1348_v1 = vpack.c.bf16 %v928_v26, %v926_v15  ;;  %v1356_v62 = vpack.c.bf16 %v968_v27, %v966_v16 }
 0x229   : > { %v930_v2 = vpop.f32.mrf.mxu0  ;;  %v970_v5 = vpop.f32.mrf.mxu1 }
 0x22a   : > { %1093 = vst [vmem:[%s1927_s8 + $0x10] sm:$0xff] %v1348_v1  ;;  %1101 = vst [vmem:[%s1927_s8 + $0x50] sm:$0xff] %v1356_v62 }
 0x22b   : > { %v932_v63 = vpop.f32.mrf.mxu0  ;;  %v972_v3 = vpop.f32.mrf.mxu1 }
 0x22c   : > { %v1349_v4 = vpack.c.bf16 %v932_v63, %v930_v2  ;;  %v1357_v6 = vpack.c.bf16 %v972_v3, %v970_v5 }
 0x22d   : > { %v936_v28 = vpop.f32.mrf.mxu0  ;;  %v976_v29 = vpop.f32.mrf.mxu1 }
 0x22e   : > { %1094 = vst [vmem:[%s1927_s8 + $0x18] sm:$0xff] %v1349_v4  ;;  %1102 = vst [vmem:[%s1927_s8 + $0x58] sm:$0xff] %v1357_v6 }
 0x22f   : > { %v938_v9 = vpop.f32.mrf.mxu0  ;;  %v978_v30 = vpop.f32.mrf.mxu1 }
 0x230   : > { %v1350_v31 = vpack.c.bf16 %v938_v9, %v936_v28  ;;  %v1358_v17 = vpack.c.bf16 %v978_v30, %v976_v29 }
 0x231   : > { %v940_v21 = vpop.f32.mrf.mxu0  ;;  %v980_v22 = vpop.f32.mrf.mxu1 }
 0x232   : > { %1095 = vst [vmem:[%s1927_s8 + $0x20] sm:$0xff] %v1350_v31  ;;  %1103 = vst [vmem:[%s1927_s8 + $0x60] sm:$0xff] %v1358_v17 }
 0x233   : > { %v942_v23 = vpop.f32.mrf.mxu0  ;;  %v982_v24 = vpop.f32.mrf.mxu1 }
 0x234   : > { %v1351_v25 = vpack.c.bf16 %v942_v23, %v940_v21  ;;  %v1359_v32 = vpack.c.bf16 %v982_v24, %v980_v22 }
 0x235   : > { %v946_v7 = vpop.f32.mrf.mxu0  ;;  %v986_v8 = vpop.f32.mrf.mxu1 }
 0x236   : > { %1096 = vst [vmem:[%s1927_s8 + $0x28] sm:$0xff] %v1351_v25  ;;  %1104 = vst [vmem:[%s1927_s8 + $0x68] sm:$0xff] %v1359_v32 }
 0x237   : > { %v948_v38 = vpop.f32.mrf.mxu0  ;;  %v988_v39 = vpop.f32.mrf.mxu1 }
 0x238   : > { %v1352_v12 = vpack.c.bf16 %v948_v38, %v946_v7  ;;  %v1360_v40 = vpack.c.bf16 %v988_v39, %v986_v8 }
 0x239   : > { %v950_v41 = vpop.f32.mrf.mxu0  ;;  %v990_v33 = vpop.f32.mrf.mxu1 }
 0x23a   : > { %1097 = vst [vmem:[%s1927_s8 + $0x30] sm:$0xff] %v1352_v12  ;;  %1105 = vst [vmem:[%s1927_s8 + $0x70] sm:$0xff] %v1360_v40 }
 0x23b   : > { %v952_v13 = vpop.f32.mrf.mxu0  ;;  %v992_v34 = vpop.f32.mrf.mxu1 }
 0x23c   : > { %v1353_v35 = vpack.c.bf16 %v952_v13, %v950_v41  ;;  %v1361_v36 = vpack.c.bf16 %v992_v34, %v990_v33 }
 0x23e   : > { %1098 = vst [vmem:[%s1927_s8 + $0x38] sm:$0xff] %v1353_v35  ;;  %1106 = vst [vmem:[%s1927_s8 + $0x78] sm:$0xff] %v1361_v36 }
 0x23f   : > { %1674 = shalt.err (!%p1671_p10)
}
 0x240   : > { %s1675_s20 = scalar_lea.hbm %s2185_s11, 2048  ;;  %s1679_s25 = scalar_lea.hbm %s2239_s3, 6144 }
 0x241   : > { %p1676_p3 = scmp.ne.s32.totalorder %s2185_s11, %s1675_s20  ;;  %p1680_p7 = scmp.lt.s32.totalorder %s2185_s11, %s2239_s3 }
 0x242   : > { %p1681_p12 = scmp.lt.s32.totalorder %s1679_s25, %s1675_s20 }
 0x243   : > { %p1677_p9 = pnand %p1676_p3, %p2257_p4 }
 0x244   : > { %p1682_p2 = por %p1681_p12, %p1680_p7 }
 0x245   : > { %p1678_p8 = pneg %p1677_p9 }
 0x247   : > { %p1683_p1 = pnand %p1682_p2, %p1678_p8 }
 0x249   : > { %1686 = shalt.err (!%p1683_p1)
}
 0x24a   : > { %s1760_s7 = smov 128   ;;  %s1761_s8 = smov 384  }
 0x24b   : > { %s1762_s18 = smov 8  }
 0x24c   : > { %1405 = dma.vmem_to_hbm [thread:$0]  (%p2257_p4), %s2187_s22, 2048, %s2185_s11, %s1108_s15, %s1760_s7, %s1761_s8, %s1762_s18  }
 0x24d PF: > { %p1427_p11 = scmp.ge.s32.totalorder %s1749_s17, 2  ;;  %s1139_s9 = sand.u32 1, %s1729_s12  }
 0x24e   : > { %p2258_p13 = scmp.ne.s32.totalorder %s2247_s24, 0  ;;  %s1140_s10 = scalar_lea.sflag [#allocation5], %s1139_s9 }
 0x250   : > { %p1419_p5 = pnand %p1427_p11, %p2258_p13 }
 0x252   : > { %p1420_p0 = pneg %p1419_p5 }
 0x254   : > { %1724 = dma.done.wait (%p1420_p0), %s1140_s10, 2048  }
 0x255   : > { %1726 = vsyncadd (%p1420_p0), %s1140_s10, 4294965248  ;;  %s18_s17 = sadd.s32 1, %s1749_s17   ;;  %s2259_s12 = smov %s1733_s13 }
 0x256   : > { %p15_p6 = scmp.ge.s32.totalorder %s18_s17, 5   ;;  %s2260_s13 = smov %s1737_s14 }
 0x257   : > { %s2261_s14 = smov %s1898_s30  ;;  %s2262_s15 = smov %s1745_s16 }
 0x258   : > { %s2263_s16 = smov %s2265_s21  ;;  %17 = sbr.rel (!%p15_p6) target bundleno = 8 (0x8), region = 89 }
 0x25d   :  { %1145 = vsyncpa [#allocation4], 1 }
 0x25e   :  { %1147 = vsyncpa [#allocation4 + $0x1], 1 }
 0x25f   :  { %1148 = vsyncpa [#allocation7], 1 }
 0x260   :  { %1149 = vsyncpa [#allocation5], 1 }
 0x261   :  { %1151 = vsyncpa [#allocation5 + $0x1], 1 }

</bundles_post_ra>
